<compile_context>
chip_gen: v6e
topology: v6e:2x2x1
jax: 0.10.0
libtpu: 0.0.40
codegen_flags: <defaults>
</compile_context>

<pallas_src>
import jax
import jax.numpy as jnp
from jax.experimental import pallas as pl
from jax.experimental.pallas import tpu as pltpu

LANE = 128


def bow_classifier_kernel(tok_ref, emb_ref, w3_ref, w4_ref, params_ref, out_ref):
    # Static (trace-time) dims.
    B, S = tok_ref.shape                 # SMEM int32 token ids
    V_pad, E_pad = emb_ref.shape
    H_pad = w3_ref.shape[1]
    C_pad = w4_ref.shape[1]
    inv_s = 1.0 / S                      # 1/S mean scale folded into the one-hot

    # ---- In-kernel scaled token-count matrix (replaces the XLA scatter). ----
    # counts[b, v] = (#times token v appears in sentence b) / S
    lane_ids = jax.lax.broadcasted_iota(jnp.int32, (1, V_pad), 1)
    rows = []
    for b in range(B):                   # B*S = 32 scalar SMEM reads, fully unrolled
        acc = jnp.zeros((1, V_pad), jnp.float32)
        for s in range(S):
            acc = acc + jnp.where(tok_ref[b, s] == lane_ids, inv_s, 0.0)
        rows.append(acc)
    counts = jnp.concatenate(rows, axis=0)                       # (B, V_pad)

    # ---- Bag-of-words mean as a single MXU matmul. ----
    rep = jnp.dot(counts, emb_ref[...],
                  preferred_element_type=jnp.float32)            # (B, E_pad)

    # Packed parameter slab rows: [gamma, beta, b3, b4] (zero padded).
    gamma = params_ref[0:1, :E_pad]
    beta = params_ref[1:2, :E_pad]
    b3 = params_ref[2:3, :H_pad]
    b4 = params_ref[3:4, :C_pad]

    # ---- BatchNorm1d (training mode): batch mean, biased variance, eps=1e-5. ----
    mu = jnp.mean(rep, axis=0, keepdims=True)                    # (1, E_pad)
    var = jnp.mean((rep - mu) * (rep - mu), axis=0, keepdims=True)
    xn = (rep - mu) * jax.lax.rsqrt(var + 1e-5) * gamma + beta   # (B, E_pad)

    # ---- fc3 + tanh ----
    h = jnp.tanh(
        jnp.dot(xn, w3_ref[...], preferred_element_type=jnp.float32) + b3)

    # ---- fc4 (lane-dense (B, C_pad) store; real columns sliced in the wrapper) ----
    out_ref[...] = (
        jnp.dot(h, w4_ref[...], preferred_element_type=jnp.float32) + b4)


def make_bow_forward(emb_table, gamma, beta, w3, b3, w4, b4):
    """Pads / packs all parameters ONCE and returns a jitted forward(tokens)."""
    V, E = emb_table.shape
    H = w3.shape[1]
    C = w4.shape[1]

    V_pad = pl.cdiv(V, LANE) * LANE
    E_pad = pl.cdiv(E, LANE) * LANE
    H_pad = pl.cdiv(H, LANE) * LANE
    C_pad = pl.cdiv(C, LANE) * LANE
    P = max(E_pad, H_pad, C_pad)

    # One-time zero padding to lane-aligned shapes (padded rows/cols are zero, so
    # padded lanes contribute nothing anywhere in the pipeline).
    emb_p = jnp.zeros((V_pad, E_pad), jnp.float32).at[:V, :E].set(emb_table)
    w3_p = jnp.zeros((E_pad, H_pad), jnp.float32).at[:E, :H].set(w3)
    w4_p = jnp.zeros((H_pad, C_pad), jnp.float32).at[:H, :C].set(w4)

    # Single packed parameter slab: rows = [gamma, beta, b3, b4] -> one DMA.
    params = jnp.zeros((4, P), jnp.float32)
    params = params.at[0, :E].set(gamma)
    params = params.at[1, :E].set(beta)
    params = params.at[2, :H].set(b3)
    params = params.at[3, :C].set(b4)

    @jax.jit
    def forward(indexed_sentence):
        B, S = indexed_sentence.shape
        grid_spec = pltpu.PrefetchScalarGridSpec(
            num_scalar_prefetch=1,          # token ids -> SMEM, used inside kernel
            grid=(1,),
            in_specs=[
                pl.BlockSpec((V_pad, E_pad), lambda i, tok: (0, 0)),
                pl.BlockSpec((E_pad, H_pad), lambda i, tok: (0, 0)),
                pl.BlockSpec((H_pad, C_pad), lambda i, tok: (0, 0)),
                pl.BlockSpec((4, P), lambda i, tok: (0, 0)),
            ],
            out_specs=pl.BlockSpec((B, C_pad), lambda i, tok: (0, 0)),
        )
        out_pad = pl.pallas_call(
            bow_classifier_kernel,
            out_shape=jax.ShapeDtypeStruct((B, C_pad), jnp.float32),
            grid_spec=grid_spec,
        )(indexed_sentence.astype(jnp.int32), emb_p, w3_p, w4_p, params)
        return out_pad[:, :C]

    return forward


def reference_forward(indexed_sentence, emb_table, gamma, beta, w3, b3, w4, b4):
    """Pure-JAX reference (gather path) for correctness checking."""
    emb = jnp.take(emb_table, indexed_sentence, axis=0)
    rep = jnp.mean(emb, axis=1)
    mu = jnp.mean(rep, axis=0, keepdims=True)
    var = jnp.mean((rep - mu) ** 2, axis=0, keepdims=True)
    xn = (rep - mu) / jnp.sqrt(var + 1e-5) * gamma + beta
    h = jnp.tanh(xn @ w3 + b3)
    return h @ w4 + b4


if __name__ == "__main__":
    # Model hyperparameters (small, consistent with from_pre_train=False, bow=True).
    vocab_size = 50
    embedding_dim = 32      # E
    hidden_layer_size = 32  # H
    num_of_classes = 6      # C
    B, S = 4, 8             # batch, sequence length

    key = jax.random.PRNGKey(0)
    k_tok, k_emb, k_w3, k_b3, k_w4, k_b4 = jax.random.split(key, 6)

    indexed_sentence = jax.random.randint(k_tok, (B, S), 0, vocab_size, dtype=jnp.int32)
    emb_table = jax.random.normal(k_emb, (vocab_size, embedding_dim), jnp.float32)
    gamma = jnp.ones((embedding_dim,), jnp.float32)
    beta = jnp.zeros((embedding_dim,), jnp.float32)
    w3 = jax.random.normal(k_w3, (embedding_dim, hidden_layer_size), jnp.float32) * 0.1
    b3 = jax.random.normal(k_b3, (hidden_layer_size,), jnp.float32) * 0.01
    w4 = jax.random.normal(k_w4, (hidden_layer_size, num_of_classes), jnp.float32) * 0.1
    b4 = jax.random.normal(k_b4, (num_of_classes,), jnp.float32) * 0.01

    # One-time parameter padding/packing; per-call path is just the Pallas call.
    bow_forward = make_bow_forward(emb_table, gamma, beta, w3, b3, w4, b4)

    out = bow_forward(indexed_sentence)
    out = jax.block_until_ready(out)

    ref = reference_forward(indexed_sentence, emb_table, gamma, beta, w3, b3, w4, b4)
    assert out.shape == (B, num_of_classes)
    assert jnp.allclose(out, ref, atol=1e-4, rtol=1e-3), "mismatch vs reference"

    print("KERNEL_OK")
</pallas_src>

<mosaic_0001>
module attributes {stable_mosaic.version = 11 : i64} {
  func.func @bow_classifier_kernel(%arg0: i32, %arg1: memref<4x8xi32, #tpu.memory_space<smem>>, %arg2: memref<128x128xf32, #tpu.memory_space<vmem>>, %arg3: memref<128x128xf32, #tpu.memory_space<vmem>>, %arg4: memref<128x128xf32, #tpu.memory_space<vmem>>, %arg5: memref<4x128xf32, #tpu.memory_space<vmem>>, %arg6: memref<4x128xf32, #tpu.memory_space<vmem>>) attributes {dimension_semantics = [#tpu.dimension_semantics<arbitrary>], iteration_bounds = array<i64: 1>, scalar_prefetch = 1 : i64, scratch_operands = 0 : i64, tpu.core_type = #tpu.core_type<tc>, window_params = [{pipeline_mode = #tpu.pipeline_mode<synchronous>, transform_indices = @transform_0, window_bounds = array<i64: 128, 128>}, {pipeline_mode = #tpu.pipeline_mode<synchronous>, transform_indices = @transform_1, window_bounds = array<i64: 128, 128>}, {pipeline_mode = #tpu.pipeline_mode<synchronous>, transform_indices = @transform_2, window_bounds = array<i64: 128, 128>}, {pipeline_mode = #tpu.pipeline_mode<synchronous>, transform_indices = @transform_3, window_bounds = array<i64: 4, 128>}, {pipeline_mode = #tpu.pipeline_mode<synchronous>, transform_indices = @transform_4, window_bounds = array<i64: 4, 128>}]} {
    %0 = tpu.iota {dimensions = array<i32: 1>} : vector<1x128xi32>
    %cst = arith.constant 0.000000e+00 : f32
    %1 = vector.broadcast %cst : f32 to vector<1x128xf32>
    %c0 = arith.constant 0 : index
    %c0_0 = arith.constant 0 : index
    %2 = memref.load %arg1[%c0, %c0_0] : memref<4x8xi32, #tpu.memory_space<smem>>
    %3 = vector.broadcast %2 : i32 to vector<1x128xi32>
    %4 = arith.cmpi eq, %3, %0 : vector<1x128xi32>
    %cst_1 = arith.constant 1.250000e-01 : f32
    %cst_2 = arith.constant 0.000000e+00 : f32
    %5 = vector.broadcast %cst_1 : f32 to vector<1x128xf32>
    %6 = vector.broadcast %cst_2 : f32 to vector<1x128xf32>
    %7 = arith.select %4, %5, %6 : vector<1x128xi1>, vector<1x128xf32>
    %8 = arith.addf %1, %7 : vector<1x128xf32>
    %c0_3 = arith.constant 0 : index
    %c1 = arith.constant 1 : index
    %9 = memref.load %arg1[%c0_3, %c1] : memref<4x8xi32, #tpu.memory_space<smem>>
    %10 = vector.broadcast %9 : i32 to vector<1x128xi32>
    %11 = arith.cmpi eq, %10, %0 : vector<1x128xi32>
    %cst_4 = arith.constant 1.250000e-01 : f32
    %cst_5 = arith.constant 0.000000e+00 : f32
    %12 = vector.broadcast %cst_4 : f32 to vector<1x128xf32>
    %13 = vector.broadcast %cst_5 : f32 to vector<1x128xf32>
    %14 = arith.select %11, %12, %13 : vector<1x128xi1>, vector<1x128xf32>
    %15 = arith.addf %8, %14 : vector<1x128xf32>
    %c0_6 = arith.constant 0 : index
    %c2 = arith.constant 2 : index
    %16 = memref.load %arg1[%c0_6, %c2] : memref<4x8xi32, #tpu.memory_space<smem>>
    %17 = vector.broadcast %16 : i32 to vector<1x128xi32>
    %18 = arith.cmpi eq, %17, %0 : vector<1x128xi32>
    %cst_7 = arith.constant 1.250000e-01 : f32
    %cst_8 = arith.constant 0.000000e+00 : f32
    %19 = vector.broadcast %cst_7 : f32 to vector<1x128xf32>
    %20 = vector.broadcast %cst_8 : f32 to vector<1x128xf32>
    %21 = arith.select %18, %19, %20 : vector<1x128xi1>, vector<1x128xf32>
    %22 = arith.addf %15, %21 : vector<1x128xf32>
    %c0_9 = arith.constant 0 : index
    %c3 = arith.constant 3 : index
    %23 = memref.load %arg1[%c0_9, %c3] : memref<4x8xi32, #tpu.memory_space<smem>>
    %24 = vector.broadcast %23 : i32 to vector<1x128xi32>
    %25 = arith.cmpi eq, %24, %0 : vector<1x128xi32>
    %cst_10 = arith.constant 1.250000e-01 : f32
    %cst_11 = arith.constant 0.000000e+00 : f32
    %26 = vector.broadcast %cst_10 : f32 to vector<1x128xf32>
    %27 = vector.broadcast %cst_11 : f32 to vector<1x128xf32>
    %28 = arith.select %25, %26, %27 : vector<1x128xi1>, vector<1x128xf32>
    %29 = arith.addf %22, %28 : vector<1x128xf32>
    %c0_12 = arith.constant 0 : index
    %c4 = arith.constant 4 : index
    %30 = memref.load %arg1[%c0_12, %c4] : memref<4x8xi32, #tpu.memory_space<smem>>
    %31 = vector.broadcast %30 : i32 to vector<1x128xi32>
    %32 = arith.cmpi eq, %31, %0 : vector<1x128xi32>
    %cst_13 = arith.constant 1.250000e-01 : f32
    %cst_14 = arith.constant 0.000000e+00 : f32
    %33 = vector.broadcast %cst_13 : f32 to vector<1x128xf32>
    %34 = vector.broadcast %cst_14 : f32 to vector<1x128xf32>
    %35 = arith.select %32, %33, %34 : vector<1x128xi1>, vector<1x128xf32>
    %36 = arith.addf %29, %35 : vector<1x128xf32>
    %c0_15 = arith.constant 0 : index
    %c5 = arith.constant 5 : index
    %37 = memref.load %arg1[%c0_15, %c5] : memref<4x8xi32, #tpu.memory_space<smem>>
    %38 = vector.broadcast %37 : i32 to vector<1x128xi32>
    %39 = arith.cmpi eq, %38, %0 : vector<1x128xi32>
    %cst_16 = arith.constant 1.250000e-01 : f32
    %cst_17 = arith.constant 0.000000e+00 : f32
    %40 = vector.broadcast %cst_16 : f32 to vector<1x128xf32>
    %41 = vector.broadcast %cst_17 : f32 to vector<1x128xf32>
    %42 = arith.select %39, %40, %41 : vector<1x128xi1>, vector<1x128xf32>
    %43 = arith.addf %36, %42 : vector<1x128xf32>
    %c0_18 = arith.constant 0 : index
    %c6 = arith.constant 6 : index
    %44 = memref.load %arg1[%c0_18, %c6] : memref<4x8xi32, #tpu.memory_space<smem>>
    %45 = vector.broadcast %44 : i32 to vector<1x128xi32>
    %46 = arith.cmpi eq, %45, %0 : vector<1x128xi32>
    %cst_19 = arith.constant 1.250000e-01 : f32
    %cst_20 = arith.constant 0.000000e+00 : f32
    %47 = vector.broadcast %cst_19 : f32 to vector<1x128xf32>
    %48 = vector.broadcast %cst_20 : f32 to vector<1x128xf32>
    %49 = arith.select %46, %47, %48 : vector<1x128xi1>, vector<1x128xf32>
    %50 = arith.addf %43, %49 : vector<1x128xf32>
    %c0_21 = arith.constant 0 : index
    %c7 = arith.constant 7 : index
    %51 = memref.load %arg1[%c0_21, %c7] : memref<4x8xi32, #tpu.memory_space<smem>>
    %52 = vector.broadcast %51 : i32 to vector<1x128xi32>
    %53 = arith.cmpi eq, %52, %0 : vector<1x128xi32>
    %cst_22 = arith.constant 1.250000e-01 : f32
    %cst_23 = arith.constant 0.000000e+00 : f32
    %54 = vector.broadcast %cst_22 : f32 to vector<1x128xf32>
    %55 = vector.broadcast %cst_23 : f32 to vector<1x128xf32>
    %56 = arith.select %53, %54, %55 : vector<1x128xi1>, vector<1x128xf32>
    %57 = arith.addf %50, %56 : vector<1x128xf32>
    %cst_24 = arith.constant 0.000000e+00 : f32
    %58 = vector.broadcast %cst_24 : f32 to vector<1x128xf32>
    %c1_25 = arith.constant 1 : index
    %c0_26 = arith.constant 0 : index
    %59 = memref.load %arg1[%c1_25, %c0_26] : memref<4x8xi32, #tpu.memory_space<smem>>
    %60 = vector.broadcast %59 : i32 to vector<1x128xi32>
    %61 = arith.cmpi eq, %60, %0 : vector<1x128xi32>
    %cst_27 = arith.constant 1.250000e-01 : f32
    %cst_28 = arith.constant 0.000000e+00 : f32
    %62 = vector.broadcast %cst_27 : f32 to vector<1x128xf32>
    %63 = vector.broadcast %cst_28 : f32 to vector<1x128xf32>
    %64 = arith.select %61, %62, %63 : vector<1x128xi1>, vector<1x128xf32>
    %65 = arith.addf %58, %64 : vector<1x128xf32>
    %c1_29 = arith.constant 1 : index
    %c1_30 = arith.constant 1 : index
    %66 = memref.load %arg1[%c1_29, %c1_30] : memref<4x8xi32, #tpu.memory_space<smem>>
    %67 = vector.broadcast %66 : i32 to vector<1x128xi32>
    %68 = arith.cmpi eq, %67, %0 : vector<1x128xi32>
    %cst_31 = arith.constant 1.250000e-01 : f32
    %cst_32 = arith.constant 0.000000e+00 : f32
    %69 = vector.broadcast %cst_31 : f32 to vector<1x128xf32>
    %70 = vector.broadcast %cst_32 : f32 to vector<1x128xf32>
    %71 = arith.select %68, %69, %70 : vector<1x128xi1>, vector<1x128xf32>
    %72 = arith.addf %65, %71 : vector<1x128xf32>
    %c1_33 = arith.constant 1 : index
    %c2_34 = arith.constant 2 : index
    %73 = memref.load %arg1[%c1_33, %c2_34] : memref<4x8xi32, #tpu.memory_space<smem>>
    %74 = vector.broadcast %73 : i32 to vector<1x128xi32>
    %75 = arith.cmpi eq, %74, %0 : vector<1x128xi32>
    %cst_35 = arith.constant 1.250000e-01 : f32
    %cst_36 = arith.constant 0.000000e+00 : f32
    %76 = vector.broadcast %cst_35 : f32 to vector<1x128xf32>
    %77 = vector.broadcast %cst_36 : f32 to vector<1x128xf32>
    %78 = arith.select %75, %76, %77 : vector<1x128xi1>, vector<1x128xf32>
    %79 = arith.addf %72, %78 : vector<1x128xf32>
    %c1_37 = arith.constant 1 : index
    %c3_38 = arith.constant 3 : index
    %80 = memref.load %arg1[%c1_37, %c3_38] : memref<4x8xi32, #tpu.memory_space<smem>>
    %81 = vector.broadcast %80 : i32 to vector<1x128xi32>
    %82 = arith.cmpi eq, %81, %0 : vector<1x128xi32>
    %cst_39 = arith.constant 1.250000e-01 : f32
    %cst_40 = arith.constant 0.000000e+00 : f32
    %83 = vector.broadcast %cst_39 : f32 to vector<1x128xf32>
    %84 = vector.broadcast %cst_40 : f32 to vector<1x128xf32>
    %85 = arith.select %82, %83, %84 : vector<1x128xi1>, vector<1x128xf32>
    %86 = arith.addf %79, %85 : vector<1x128xf32>
    %c1_41 = arith.constant 1 : index
    %c4_42 = arith.constant 4 : index
    %87 = memref.load %arg1[%c1_41, %c4_42] : memref<4x8xi32, #tpu.memory_space<smem>>
    %88 = vector.broadcast %87 : i32 to vector<1x128xi32>
    %89 = arith.cmpi eq, %88, %0 : vector<1x128xi32>
    %cst_43 = arith.constant 1.250000e-01 : f32
    %cst_44 = arith.constant 0.000000e+00 : f32
    %90 = vector.broadcast %cst_43 : f32 to vector<1x128xf32>
    %91 = vector.broadcast %cst_44 : f32 to vector<1x128xf32>
    %92 = arith.select %89, %90, %91 : vector<1x128xi1>, vector<1x128xf32>
    %93 = arith.addf %86, %92 : vector<1x128xf32>
    %c1_45 = arith.constant 1 : index
    %c5_46 = arith.constant 5 : index
    %94 = memref.load %arg1[%c1_45, %c5_46] : memref<4x8xi32, #tpu.memory_space<smem>>
    %95 = vector.broadcast %94 : i32 to vector<1x128xi32>
    %96 = arith.cmpi eq, %95, %0 : vector<1x128xi32>
    %cst_47 = arith.constant 1.250000e-01 : f32
    %cst_48 = arith.constant 0.000000e+00 : f32
    %97 = vector.broadcast %cst_47 : f32 to vector<1x128xf32>
    %98 = vector.broadcast %cst_48 : f32 to vector<1x128xf32>
    %99 = arith.select %96, %97, %98 : vector<1x128xi1>, vector<1x128xf32>
    %100 = arith.addf %93, %99 : vector<1x128xf32>
    %c1_49 = arith.constant 1 : index
    %c6_50 = arith.constant 6 : index
    %101 = memref.load %arg1[%c1_49, %c6_50] : memref<4x8xi32, #tpu.memory_space<smem>>
    %102 = vector.broadcast %101 : i32 to vector<1x128xi32>
    %103 = arith.cmpi eq, %102, %0 : vector<1x128xi32>
    %cst_51 = arith.constant 1.250000e-01 : f32
    %cst_52 = arith.constant 0.000000e+00 : f32
    %104 = vector.broadcast %cst_51 : f32 to vector<1x128xf32>
    %105 = vector.broadcast %cst_52 : f32 to vector<1x128xf32>
    %106 = arith.select %103, %104, %105 : vector<1x128xi1>, vector<1x128xf32>
    %107 = arith.addf %100, %106 : vector<1x128xf32>
    %c1_53 = arith.constant 1 : index
    %c7_54 = arith.constant 7 : index
    %108 = memref.load %arg1[%c1_53, %c7_54] : memref<4x8xi32, #tpu.memory_space<smem>>
    %109 = vector.broadcast %108 : i32 to vector<1x128xi32>
    %110 = arith.cmpi eq, %109, %0 : vector<1x128xi32>
    %cst_55 = arith.constant 1.250000e-01 : f32
    %cst_56 = arith.constant 0.000000e+00 : f32
    %111 = vector.broadcast %cst_55 : f32 to vector<1x128xf32>
    %112 = vector.broadcast %cst_56 : f32 to vector<1x128xf32>
    %113 = arith.select %110, %111, %112 : vector<1x128xi1>, vector<1x128xf32>
    %114 = arith.addf %107, %113 : vector<1x128xf32>
    %cst_57 = arith.constant 0.000000e+00 : f32
    %115 = vector.broadcast %cst_57 : f32 to vector<1x128xf32>
    %c2_58 = arith.constant 2 : index
    %c0_59 = arith.constant 0 : index
    %116 = memref.load %arg1[%c2_58, %c0_59] : memref<4x8xi32, #tpu.memory_space<smem>>
    %117 = vector.broadcast %116 : i32 to vector<1x128xi32>
    %118 = arith.cmpi eq, %117, %0 : vector<1x128xi32>
    %cst_60 = arith.constant 1.250000e-01 : f32
    %cst_61 = arith.constant 0.000000e+00 : f32
    %119 = vector.broadcast %cst_60 : f32 to vector<1x128xf32>
    %120 = vector.broadcast %cst_61 : f32 to vector<1x128xf32>
    %121 = arith.select %118, %119, %120 : vector<1x128xi1>, vector<1x128xf32>
    %122 = arith.addf %115, %121 : vector<1x128xf32>
    %c2_62 = arith.constant 2 : index
    %c1_63 = arith.constant 1 : index
    %123 = memref.load %arg1[%c2_62, %c1_63] : memref<4x8xi32, #tpu.memory_space<smem>>
    %124 = vector.broadcast %123 : i32 to vector<1x128xi32>
    %125 = arith.cmpi eq, %124, %0 : vector<1x128xi32>
    %cst_64 = arith.constant 1.250000e-01 : f32
    %cst_65 = arith.constant 0.000000e+00 : f32
    %126 = vector.broadcast %cst_64 : f32 to vector<1x128xf32>
    %127 = vector.broadcast %cst_65 : f32 to vector<1x128xf32>
    %128 = arith.select %125, %126, %127 : vector<1x128xi1>, vector<1x128xf32>
    %129 = arith.addf %122, %128 : vector<1x128xf32>
    %c2_66 = arith.constant 2 : index
    %c2_67 = arith.constant 2 : index
    %130 = memref.load %arg1[%c2_66, %c2_67] : memref<4x8xi32, #tpu.memory_space<smem>>
    %131 = vector.broadcast %130 : i32 to vector<1x128xi32>
    %132 = arith.cmpi eq, %131, %0 : vector<1x128xi32>
    %cst_68 = arith.constant 1.250000e-01 : f32
    %cst_69 = arith.constant 0.000000e+00 : f32
    %133 = vector.broadcast %cst_68 : f32 to vector<1x128xf32>
    %134 = vector.broadcast %cst_69 : f32 to vector<1x128xf32>
    %135 = arith.select %132, %133, %134 : vector<1x128xi1>, vector<1x128xf32>
    %136 = arith.addf %129, %135 : vector<1x128xf32>
    %c2_70 = arith.constant 2 : index
    %c3_71 = arith.constant 3 : index
    %137 = memref.load %arg1[%c2_70, %c3_71] : memref<4x8xi32, #tpu.memory_space<smem>>
    %138 = vector.broadcast %137 : i32 to vector<1x128xi32>
    %139 = arith.cmpi eq, %138, %0 : vector<1x128xi32>
    %cst_72 = arith.constant 1.250000e-01 : f32
    %cst_73 = arith.constant 0.000000e+00 : f32
    %140 = vector.broadcast %cst_72 : f32 to vector<1x128xf32>
    %141 = vector.broadcast %cst_73 : f32 to vector<1x128xf32>
    %142 = arith.select %139, %140, %141 : vector<1x128xi1>, vector<1x128xf32>
    %143 = arith.addf %136, %142 : vector<1x128xf32>
    %c2_74 = arith.constant 2 : index
    %c4_75 = arith.constant 4 : index
    %144 = memref.load %arg1[%c2_74, %c4_75] : memref<4x8xi32, #tpu.memory_space<smem>>
    %145 = vector.broadcast %144 : i32 to vector<1x128xi32>
    %146 = arith.cmpi eq, %145, %0 : vector<1x128xi32>
    %cst_76 = arith.constant 1.250000e-01 : f32
    %cst_77 = arith.constant 0.000000e+00 : f32
    %147 = vector.broadcast %cst_76 : f32 to vector<1x128xf32>
    %148 = vector.broadcast %cst_77 : f32 to vector<1x128xf32>
    %149 = arith.select %146, %147, %148 : vector<1x128xi1>, vector<1x128xf32>
    %150 = arith.addf %143, %149 : vector<1x128xf32>
    %c2_78 = arith.constant 2 : index
    %c5_79 = arith.constant 5 : index
    %151 = memref.load %arg1[%c2_78, %c5_79] : memref<4x8xi32, #tpu.memory_space<smem>>
    %152 = vector.broadcast %151 : i32 to vector<1x128xi32>
    %153 = arith.cmpi eq, %152, %0 : vector<1x128xi32>
    %cst_80 = arith.constant 1.250000e-01 : f32
    %cst_81 = arith.constant 0.000000e+00 : f32
    %154 = vector.broadcast %cst_80 : f32 to vector<1x128xf32>
    %155 = vector.broadcast %cst_81 : f32 to vector<1x128xf32>
    %156 = arith.select %153, %154, %155 : vector<1x128xi1>, vector<1x128xf32>
    %157 = arith.addf %150, %156 : vector<1x128xf32>
    %c2_82 = arith.constant 2 : index
    %c6_83 = arith.constant 6 : index
    %158 = memref.load %arg1[%c2_82, %c6_83] : memref<4x8xi32, #tpu.memory_space<smem>>
    %159 = vector.broadcast %158 : i32 to vector<1x128xi32>
    %160 = arith.cmpi eq, %159, %0 : vector<1x128xi32>
    %cst_84 = arith.constant 1.250000e-01 : f32
    %cst_85 = arith.constant 0.000000e+00 : f32
    %161 = vector.broadcast %cst_84 : f32 to vector<1x128xf32>
    %162 = vector.broadcast %cst_85 : f32 to vector<1x128xf32>
    %163 = arith.select %160, %161, %162 : vector<1x128xi1>, vector<1x128xf32>
    %164 = arith.addf %157, %163 : vector<1x128xf32>
    %c2_86 = arith.constant 2 : index
    %c7_87 = arith.constant 7 : index
    %165 = memref.load %arg1[%c2_86, %c7_87] : memref<4x8xi32, #tpu.memory_space<smem>>
    %166 = vector.broadcast %165 : i32 to vector<1x128xi32>
    %167 = arith.cmpi eq, %166, %0 : vector<1x128xi32>
    %cst_88 = arith.constant 1.250000e-01 : f32
    %cst_89 = arith.constant 0.000000e+00 : f32
    %168 = vector.broadcast %cst_88 : f32 to vector<1x128xf32>
    %169 = vector.broadcast %cst_89 : f32 to vector<1x128xf32>
    %170 = arith.select %167, %168, %169 : vector<1x128xi1>, vector<1x128xf32>
    %171 = arith.addf %164, %170 : vector<1x128xf32>
    %cst_90 = arith.constant 0.000000e+00 : f32
    %172 = vector.broadcast %cst_90 : f32 to vector<1x128xf32>
    %c3_91 = arith.constant 3 : index
    %c0_92 = arith.constant 0 : index
    %173 = memref.load %arg1[%c3_91, %c0_92] : memref<4x8xi32, #tpu.memory_space<smem>>
    %174 = vector.broadcast %173 : i32 to vector<1x128xi32>
    %175 = arith.cmpi eq, %174, %0 : vector<1x128xi32>
    %cst_93 = arith.constant 1.250000e-01 : f32
    %cst_94 = arith.constant 0.000000e+00 : f32
    %176 = vector.broadcast %cst_93 : f32 to vector<1x128xf32>
    %177 = vector.broadcast %cst_94 : f32 to vector<1x128xf32>
    %178 = arith.select %175, %176, %177 : vector<1x128xi1>, vector<1x128xf32>
    %179 = arith.addf %172, %178 : vector<1x128xf32>
    %c3_95 = arith.constant 3 : index
    %c1_96 = arith.constant 1 : index
    %180 = memref.load %arg1[%c3_95, %c1_96] : memref<4x8xi32, #tpu.memory_space<smem>>
    %181 = vector.broadcast %180 : i32 to vector<1x128xi32>
    %182 = arith.cmpi eq, %181, %0 : vector<1x128xi32>
    %cst_97 = arith.constant 1.250000e-01 : f32
    %cst_98 = arith.constant 0.000000e+00 : f32
    %183 = vector.broadcast %cst_97 : f32 to vector<1x128xf32>
    %184 = vector.broadcast %cst_98 : f32 to vector<1x128xf32>
    %185 = arith.select %182, %183, %184 : vector<1x128xi1>, vector<1x128xf32>
    %186 = arith.addf %179, %185 : vector<1x128xf32>
    %c3_99 = arith.constant 3 : index
    %c2_100 = arith.constant 2 : index
    %187 = memref.load %arg1[%c3_99, %c2_100] : memref<4x8xi32, #tpu.memory_space<smem>>
    %188 = vector.broadcast %187 : i32 to vector<1x128xi32>
    %189 = arith.cmpi eq, %188, %0 : vector<1x128xi32>
    %cst_101 = arith.constant 1.250000e-01 : f32
    %cst_102 = arith.constant 0.000000e+00 : f32
    %190 = vector.broadcast %cst_101 : f32 to vector<1x128xf32>
    %191 = vector.broadcast %cst_102 : f32 to vector<1x128xf32>
    %192 = arith.select %189, %190, %191 : vector<1x128xi1>, vector<1x128xf32>
    %193 = arith.addf %186, %192 : vector<1x128xf32>
    %c3_103 = arith.constant 3 : index
    %c3_104 = arith.constant 3 : index
    %194 = memref.load %arg1[%c3_103, %c3_104] : memref<4x8xi32, #tpu.memory_space<smem>>
    %195 = vector.broadcast %194 : i32 to vector<1x128xi32>
    %196 = arith.cmpi eq, %195, %0 : vector<1x128xi32>
    %cst_105 = arith.constant 1.250000e-01 : f32
    %cst_106 = arith.constant 0.000000e+00 : f32
    %197 = vector.broadcast %cst_105 : f32 to vector<1x128xf32>
    %198 = vector.broadcast %cst_106 : f32 to vector<1x128xf32>
    %199 = arith.select %196, %197, %198 : vector<1x128xi1>, vector<1x128xf32>
    %200 = arith.addf %193, %199 : vector<1x128xf32>
    %c3_107 = arith.constant 3 : index
    %c4_108 = arith.constant 4 : index
    %201 = memref.load %arg1[%c3_107, %c4_108] : memref<4x8xi32, #tpu.memory_space<smem>>
    %202 = vector.broadcast %201 : i32 to vector<1x128xi32>
    %203 = arith.cmpi eq, %202, %0 : vector<1x128xi32>
    %cst_109 = arith.constant 1.250000e-01 : f32
    %cst_110 = arith.constant 0.000000e+00 : f32
    %204 = vector.broadcast %cst_109 : f32 to vector<1x128xf32>
    %205 = vector.broadcast %cst_110 : f32 to vector<1x128xf32>
    %206 = arith.select %203, %204, %205 : vector<1x128xi1>, vector<1x128xf32>
    %207 = arith.addf %200, %206 : vector<1x128xf32>
    %c3_111 = arith.constant 3 : index
    %c5_112 = arith.constant 5 : index
    %208 = memref.load %arg1[%c3_111, %c5_112] : memref<4x8xi32, #tpu.memory_space<smem>>
    %209 = vector.broadcast %208 : i32 to vector<1x128xi32>
    %210 = arith.cmpi eq, %209, %0 : vector<1x128xi32>
    %cst_113 = arith.constant 1.250000e-01 : f32
    %cst_114 = arith.constant 0.000000e+00 : f32
    %211 = vector.broadcast %cst_113 : f32 to vector<1x128xf32>
    %212 = vector.broadcast %cst_114 : f32 to vector<1x128xf32>
    %213 = arith.select %210, %211, %212 : vector<1x128xi1>, vector<1x128xf32>
    %214 = arith.addf %207, %213 : vector<1x128xf32>
    %c3_115 = arith.constant 3 : index
    %c6_116 = arith.constant 6 : index
    %215 = memref.load %arg1[%c3_115, %c6_116] : memref<4x8xi32, #tpu.memory_space<smem>>
    %216 = vector.broadcast %215 : i32 to vector<1x128xi32>
    %217 = arith.cmpi eq, %216, %0 : vector<1x128xi32>
    %cst_117 = arith.constant 1.250000e-01 : f32
    %cst_118 = arith.constant 0.000000e+00 : f32
    %218 = vector.broadcast %cst_117 : f32 to vector<1x128xf32>
    %219 = vector.broadcast %cst_118 : f32 to vector<1x128xf32>
    %220 = arith.select %217, %218, %219 : vector<1x128xi1>, vector<1x128xf32>
    %221 = arith.addf %214, %220 : vector<1x128xf32>
    %c3_119 = arith.constant 3 : index
    %c7_120 = arith.constant 7 : index
    %222 = memref.load %arg1[%c3_119, %c7_120] : memref<4x8xi32, #tpu.memory_space<smem>>
    %223 = vector.broadcast %222 : i32 to vector<1x128xi32>
    %224 = arith.cmpi eq, %223, %0 : vector<1x128xi32>
    %cst_121 = arith.constant 1.250000e-01 : f32
    %cst_122 = arith.constant 0.000000e+00 : f32
    %225 = vector.broadcast %cst_121 : f32 to vector<1x128xf32>
    %226 = vector.broadcast %cst_122 : f32 to vector<1x128xf32>
    %227 = arith.select %224, %225, %226 : vector<1x128xi1>, vector<1x128xf32>
    %228 = arith.addf %221, %227 : vector<1x128xf32>
    %229 = tpu.concatenate %57, %114, %171, %228 in 0 : vector<1x128xf32>, vector<1x128xf32>, vector<1x128xf32>, vector<1x128xf32> -> vector<4x128xf32>
    %c0_123 = arith.constant 0 : index
    %c0_124 = arith.constant 0 : index
    %230 = vector.load %arg2[%c0_123, %c0_124] : memref<128x128xf32, #tpu.memory_space<vmem>>, vector<128x128xf32>
    %cst_125 = arith.constant dense<0.000000e+00> : vector<4x128xf32>
    %231 = tpu.matmul %229, %230, %cst_125 {dimension_numbers = #tpu.dot_dimension_numbers<[1], [0], [0], [1], [0, 0, 1, 1], [], []>} : vector<4x128xf32>, vector<128x128xf32>, vector<4x128xf32> -> vector<4x128xf32>
    %c0_126 = arith.constant 0 : index
    %c0_127 = arith.constant 0 : index
    %232 = vector.load %arg5[%c0_126, %c0_127] : memref<4x128xf32, #tpu.memory_space<vmem>>, vector<1x128xf32>
    %c1_128 = arith.constant 1 : index
    %c0_129 = arith.constant 0 : index
    %233 = vector.load %arg5[%c1_128, %c0_129] : memref<4x128xf32, #tpu.memory_space<vmem>>, vector<1x128xf32>
    %c2_130 = arith.constant 2 : index
    %c0_131 = arith.constant 0 : index
    %234 = vector.load %arg5[%c2_130, %c0_131] : memref<4x128xf32, #tpu.memory_space<vmem>>, vector<1x128xf32>
    %c3_132 = arith.constant 3 : index
    %c0_133 = arith.constant 0 : index
    %235 = vector.load %arg5[%c3_132, %c0_133] : memref<4x128xf32, #tpu.memory_space<vmem>>, vector<1x128xf32>
    %cst_134 = arith.constant dense<0.000000e+00> : vector<128xf32>
    %236 = vector.multi_reduction <add>, %231, %cst_134 [0] : vector<4x128xf32> to vector<128xf32>
    %237 = vector.shape_cast %236 : vector<128xf32> to vector<1x128xf32>
    %cst_135 = arith.constant 4.000000e+00 : f32
    %238 = vector.broadcast %cst_135 : f32 to vector<1x128xf32>
    %239 = arith.divf %237, %238 : vector<1x128xf32>
    %240 = vector.broadcast %239 : vector<1x128xf32> to vector<4x128xf32>
    %241 = arith.subf %231, %240 : vector<4x128xf32>
    %242 = vector.broadcast %239 : vector<1x128xf32> to vector<4x128xf32>
    %243 = arith.subf %231, %242 : vector<4x128xf32>
    %244 = arith.mulf %241, %243 : vector<4x128xf32>
    %cst_136 = arith.constant dense<0.000000e+00> : vector<128xf32>
    %245 = vector.multi_reduction <add>, %244, %cst_136 [0] : vector<4x128xf32> to vector<128xf32>
    %246 = vector.shape_cast %245 : vector<128xf32> to vector<1x128xf32>
    %cst_137 = arith.constant 4.000000e+00 : f32
    %247 = vector.broadcast %cst_137 : f32 to vector<1x128xf32>
    %248 = arith.divf %246, %247 : vector<1x128xf32>
    %249 = vector.broadcast %239 : vector<1x128xf32> to vector<4x128xf32>
    %250 = arith.subf %231, %249 : vector<4x128xf32>
    %cst_138 = arith.constant 9.99999974E-6 : f32
    %251 = vector.broadcast %cst_138 : f32 to vector<1x128xf32>
    %252 = arith.addf %248, %251 : vector<1x128xf32>
    %253 = math.rsqrt %252 : vector<1x128xf32>
    %254 = vector.broadcast %253 : vector<1x128xf32> to vector<4x128xf32>
    %255 = arith.mulf %250, %254 : vector<4x128xf32>
    %256 = vector.broadcast %232 : vector<1x128xf32> to vector<4x128xf32>
    %257 = arith.mulf %255, %256 : vector<4x128xf32>
    %258 = vector.broadcast %233 : vector<1x128xf32> to vector<4x128xf32>
    %259 = arith.addf %257, %258 : vector<4x128xf32>
    %c0_139 = arith.constant 0 : index
    %c0_140 = arith.constant 0 : index
    %260 = vector.load %arg3[%c0_139, %c0_140] : memref<128x128xf32, #tpu.memory_space<vmem>>, vector<128x128xf32>
    %cst_141 = arith.constant dense<0.000000e+00> : vector<4x128xf32>
    %261 = tpu.matmul %259, %260, %cst_141 {dimension_numbers = #tpu.dot_dimension_numbers<[1], [0], [0], [1], [0, 0, 1, 1], [], []>} : vector<4x128xf32>, vector<128x128xf32>, vector<4x128xf32> -> vector<4x128xf32>
    %262 = vector.broadcast %234 : vector<1x128xf32> to vector<4x128xf32>
    %263 = arith.addf %261, %262 : vector<4x128xf32>
    %264 = math.tanh %263 : vector<4x128xf32>
    %c0_142 = arith.constant 0 : index
    %c0_143 = arith.constant 0 : index
    %265 = vector.load %arg4[%c0_142, %c0_143] : memref<128x128xf32, #tpu.memory_space<vmem>>, vector<128x128xf32>
    %cst_144 = arith.constant dense<0.000000e+00> : vector<4x128xf32>
    %266 = tpu.matmul %264, %265, %cst_144 {dimension_numbers = #tpu.dot_dimension_numbers<[1], [0], [0], [1], [0, 0, 1, 1], [], []>} : vector<4x128xf32>, vector<128x128xf32>, vector<4x128xf32> -> vector<4x128xf32>
    %267 = vector.broadcast %235 : vector<1x128xf32> to vector<4x128xf32>
    %268 = arith.addf %266, %267 : vector<4x128xf32>
    %c0_145 = arith.constant 0 : index
    %c0_146 = arith.constant 0 : index
    %269 = vector.load %arg6[%c0_145, %c0_146] : memref<4x128xf32, #tpu.memory_space<vmem>>, vector<4x128xf32>
    tpu.vector_store %arg6[%c0_145, %c0_146], %268 {strides = array<i32>} : memref<4x128xf32, #tpu.memory_space<vmem>>, vector<4x128xf32>,
    return
  }
  func.func @transform_0(%arg0: i32, %arg1: memref<4x8xi32, #tpu.memory_space<smem>>) -> (i32, i32) {
    %c0_i32 = arith.constant 0 : i32
    %c0_i32_0 = arith.constant 0 : i32
    %c0_i32_1 = arith.constant 0 : i32
    return %c0_i32, %c0_i32_0 : i32, i32
  }
  func.func @transform_1(%arg0: i32, %arg1: memref<4x8xi32, #tpu.memory_space<smem>>) -> (i32, i32) {
    %c0_i32 = arith.constant 0 : i32
    %c0_i32_0 = arith.constant 0 : i32
    %c0_i32_1 = arith.constant 0 : i32
    return %c0_i32, %c0_i32_0 : i32, i32
  }
  func.func @transform_2(%arg0: i32, %arg1: memref<4x8xi32, #tpu.memory_space<smem>>) -> (i32, i32) {
    %c0_i32 = arith.constant 0 : i32
    %c0_i32_0 = arith.constant 0 : i32
    %c0_i32_1 = arith.constant 0 : i32
    return %c0_i32, %c0_i32_0 : i32, i32
  }
  func.func @transform_3(%arg0: i32, %arg1: memref<4x8xi32, #tpu.memory_space<smem>>) -> (i32, i32) {
    %c0_i32 = arith.constant 0 : i32
    %c0_i32_0 = arith.constant 0 : i32
    %c0_i32_1 = arith.constant 0 : i32
    return %c0_i32, %c0_i32_0 : i32, i32
  }
  func.func @transform_4(%arg0: i32, %arg1: memref<4x8xi32, #tpu.memory_space<smem>>) -> (i32, i32) {
    %c0_i32 = arith.constant 0 : i32
    %c0_i32_0 = arith.constant 0 : i32
    %c0_i32_1 = arith.constant 0 : i32
    return %c0_i32, %c0_i32_0 : i32, i32
  }
}

</mosaic_0001>

<bundles_post_ra>
// kernel: forward.1
= control target key start
LH: loop header
LB: loop body
LE: loop exit
PB: predicated region body
PF: predicated region fallthrough
CT: control target
= control target key end

     0   :  { %s853_s18 = smov [#allocation3]   ;;  %s1147_s0 = inlined_call_operand.hbm [shape: s32[4,8], index: 0, kind: input, shape index: {}]   ;;  %s1148_s1 = inlined_call_operand.hbm [shape: f32[128,128], index: 1, kind: input, shape index: {}]   ;;  %s1149_s2 = inlined_call_operand.hbm [shape: f32[128,128], index: 2, kind: input, shape index: {}]   ;;  %s1150_s3 = inlined_call_operand.hbm [shape: f32[128,128], index: 3, kind: input, shape index: {}]   ;;  %s1151_s4 = inlined_call_operand.vmem [shape: f32[4,128], index: 4, kind: input, shape index: {}]   ;;  %s1152_s5 = inlined_call_operand.hbm [shape: f32[4,128], index: 5, kind: output, shape index: {}]  }
   0x1   :  { %11 = dma.hbm_to_smem %s1147_s0, 64, %s853_s18, [#allocation2] }
   0x2   :  { %845 = dma.done.wait [#allocation2], 64 }
   0x3   :  { %846 = vsyncadd [#allocation2], 4294967232 }
   0x4   :  { %13 = sfence }
   0x5   :  { %14 = vsyncpa [#allocation5], 0 }
   0x6   :  { %15 = vsyncpa [#allocation8], 0 }
   0x7   :  { %16 = vsyncpa [#allocation6], 0  ;;  %s854_s21 = smov [#allocation7]   ;;  %s855_s23 = smov [#allocation4]  }
   0x8   :  { %s34_s22 = sshll.u32 %s854_s21, 4  ;;  %s22_s24 = sshll.u32 %s855_s23, 4  ;;  %s35_s22 = int_to_ptr.vmem [resolvable:$true] %s34_s22  ;;  %s23_s24 = int_to_ptr.vmem [resolvable:$true] %s22_s24 }
   0x9   :  { %s773_s25 = scalar_lea.vmem %s35_s22, 2048  ;;  %p778_p1 = scmp.lt.s32.totalorder %s35_s22, %s35_s22 }
   0xa   :  { %p774_p0 = scmp.ne.s32.totalorder %s35_s22, %s773_s25  ;;  %p779_p2 = scmp.lt.s32.totalorder %s773_s25, %s773_s25 }
   0xc   :  { %p780_p3 = por %p779_p2, %p778_p1 }
   0xe   :  { %p781_p4 = pnand %p780_p3, %p774_p0 }
  0x10   :  { %784 = shalt.err (!%p781_p4)
}
  0x11   :  { %s856_s0 = smov 128   ;;  %s857_s26 = smov 8  }
  0x12   :  { %40 = dma.hbm_to_vmem [thread:$0]  %s1149_s2, 2048, %s35_s22, [#allocation8], %s856_s0, %s856_s0, %s857_s26  }
  0x13   :  { %s793_s29 = scalar_lea.vmem %s23_s24, 2048  ;;  %p798_p6 = scmp.lt.s32.totalorder %s23_s24, %s23_s24 }
  0x14   :  { %p794_p5 = scmp.ne.s32.totalorder %s23_s24, %s793_s29  ;;  %p799_p7 = scmp.lt.s32.totalorder %s793_s29, %s793_s29 }
  0x16   :  { %p800_p8 = por %p799_p7, %p798_p6 }
  0x18   :  { %p801_p9 = pnand %p800_p8, %p794_p5 }
  0x1a   :  { %804 = shalt.err (!%p801_p9)
}
  0x1b   :  { %28 = dma.hbm_to_vmem [thread:$0]  %s1148_s1, 2048, %s23_s24, [#allocation5], %s856_s0, %s856_s0, %s857_s26  }
  0x1c   :  { %s858_s7 = smov [#allocation9]  }
  0x1d   :  { %s46_s8 = sshll.u32 %s858_s7, 4  ;;  %s47_s8 = int_to_ptr.vmem [resolvable:$true] %s46_s8 }
  0x1e   :  { %s813_s9 = scalar_lea.vmem %s47_s8, 2048  ;;  %p818_p11 = scmp.lt.s32.totalorder %s47_s8, %s47_s8 }
  0x1f   :  { %p814_p10 = scmp.ne.s32.totalorder %s47_s8, %s813_s9  ;;  %p819_p12 = scmp.lt.s32.totalorder %s813_s9, %s813_s9 }
  0x21   :  { %p820_p13 = por %p819_p12, %p818_p11 }
  0x23   :  { %p821_p0 = pnand %p820_p13, %p814_p10 }
  0x25   :  { %824 = shalt.err (!%p821_p0)
}
  0x26   :  { %52 = dma.hbm_to_vmem [thread:$0]  %s1150_s3, 2048, %s47_s8, [#allocation8], %s856_s0, %s856_s0, %s857_s26  }
  0x27   :  { %847 = dma.done.wait [#allocation5], 2048  }
  0x28   :  { %848 = vsyncadd [#allocation5], 4294965248 }
  0x29   :  { %849 = dma.done.wait [#allocation8], 4096  }
  0x2a   :  { %850 = vsyncadd [#allocation8], 4294963200  ;;  %v64_v0 = vlaneseq  ;;  %v859_v1 = vmov 0.0   ;;  %vm860_vm0 = vmmov 0   ;;  %s66_s1 = sld [smem:[#allocation3]]  ;;  %v247_v3 = vld [vmem:[#allocation4 + $0x78] sm:$0xff] }
  0x2b   :  { %639 = vmatprep.subr.mxu0 %v859_v1  ;;  %671 = vmatprep.mubr.msk.f32.mxu0 %vm860_vm0, %v859_v1  ;;  %s553_s11 = sld [smem:[#allocation3 + $0x1]]  ;;  %v246_v4 = vld [vmem:[#allocation4 + $0x70] sm:$0xff]  ;;  %v245_v7 = vld [vmem:[#allocation4 + $0x68] sm:$0xff]  ;;  %v244_v12 = vld [vmem:[#allocation4 + $0x60] sm:$0xff] }
  0x2c   :  { %674 = vmatprep.subr.mxu1 %v859_v1  ;;  %706 = vmatprep.mubr.msk.f32.mxu1 %vm860_vm0, %v859_v1  ;;  %s554_s3 = sld [smem:[#allocation3 + $0x2]]  ;;  %v910_v2 = vand.u32 127, %v64_v0  ;;  %v243_v18 = vld [vmem:[#allocation4 + $0x58] sm:$0xff]  ;;  %v242_v20 = vld [vmem:[#allocation4 + $0x50] sm:$0xff]  ;;  %v241_v26 = vld [vmem:[#allocation4 + $0x48] sm:$0xff] }
  0x2d   :  { %s555_s12 = sld [smem:[#allocation3 + $0x3]]  ;;  %640 = vmatpush3.msra.mxu0 %v247_v3  ;;  %v240_v33 = vld [vmem:[#allocation4 + $0x40] sm:$0xff]  ;;  %v239_v41 = vld [vmem:[#allocation4 + $0x38] sm:$0xff]  ;;  %v238_v47 = vld [vmem:[#allocation4 + $0x30] sm:$0xff] }
  0x2e   :  { %s912_s13 = sld [smem:[#allocation3 + $0x4]]  ;;  %641 = vmatprep.subr.mxu0 %v859_v1  ;;  %v237_v56 = vld [vmem:[#allocation4 + $0x28] sm:$0xff]  ;;  %v236_v62 = vld [vmem:[#allocation4 + $0x20] sm:$0xff] }
  0x2f   :  { %s914_s14 = sld [smem:[#allocation3 + $0x5]]  ;;  %642 = vmatpush3.msra.mxu0 %v246_v4 }
  0x30   :  { %v67_v5 = vstv %s66_s1  ;;  %s916_s15 = sld [smem:[#allocation3 + $0x6]]  ;;  %643 = vmatprep.subr.mxu0 %v859_v1 }
  0x31   :  { %vm68_vm1 = vcmp.eq.s32.totalorder %v67_v5, %v910_v2  ;;  %v72_v6 = vstv %s553_s11  ;;  %s919_s16 = sld [smem:[#allocation3 + $0x7]]  ;;  %644 = vmatpush3.msra.mxu0 %v245_v7 }
  0x32   :  { %v69_v8 = vsel %vm68_vm1, 0.125, %v859_v1  ;;  %vm73_vm2 = vcmp.eq.s32.totalorder %v72_v6, %v910_v2  ;;  %v77_v9 = vstv %s554_s3  ;;  %s924_s17 = sld [smem:[#allocation3 + $0x80]]  ;;  %645 = vmatprep.subr.mxu0 %v859_v1 }
  0x33   :  { %v74_v10 = vsel %vm73_vm2, 0.125, %v859_v1  ;;  %vm78_vm3 = vcmp.eq.s32.totalorder %v77_v9, %v910_v2  ;;  %v82_v11 = vstv %s555_s12  ;;  %s928_s18 = sld [smem:[#allocation3 + $0x81]]  ;;  %646 = vmatpush3.msra.mxu0 %v244_v12 }
  0x34   :  { %v75_v13 = vadd.f32 %v74_v10, %v69_v8  ;;  %v79_v14 = vsel %vm78_vm3, 0.125, %v859_v1  ;;  %vm83_vm4 = vcmp.eq.s32.totalorder %v82_v11, %v910_v2  ;;  %v87_v15 = vstv %s912_s13  ;;  %s934_s19 = sld [smem:[#allocation3 + $0x82]]  ;;  %647 = vmatprep.subr.mxu0 %v859_v1  ;;  %v235_v8 = vld [vmem:[#allocation4 + $0x18] sm:$0xff] }
  0x35   :  { %v84_v16 = vsel %vm83_vm4, 0.125, %v859_v1  ;;  %v92_v17 = vstv %s914_s14  ;;  %s938_s20 = sld [smem:[#allocation3 + $0x83]]  ;;  %vm88_vm5 = vcmp.eq.s32.totalorder %v87_v15, %v910_v2  ;;  %648 = vmatpush3.msra.mxu0 %v243_v18  ;;  %v234_v15 = vld [vmem:[#allocation4 + $0x10] sm:$0xff] }
  0x36   :  { %v80_v19 = vadd.f32 %v79_v14, %v75_v13  ;;  %s942_s21 = sld [smem:[#allocation3 + $0x84]]  ;;  %vm93_vm6 = vcmp.eq.s32.totalorder %v92_v17, %v910_v2  ;;  %v97_v22 = vstv %s916_s15  ;;  %v89_v24 = vsel %vm88_vm5, 0.125, %v859_v1  ;;  %649 = vmatprep.subr.mxu0 %v859_v1 }
  0x37   :  { %s945_s22 = sld [smem:[#allocation3 + $0x85]]  ;;  %v94_v27 = vsel %vm93_vm6, 0.125, %v859_v1  ;;  %650 = vmatpush3.msra.mxu0 %v242_v20  ;;  %vm965_vm9 = vcmp.eq.s32.totalorder %v97_v22, %v910_v2  ;;  %v102_v37 = vstv %s919_s16 }
  0x38   :  { %v85_v21 = vadd.f32 %v84_v16, %v80_v19  ;;  %v107_v23 = vstv %s924_s17  ;;  %s950_s23 = sld [smem:[#allocation3 + $0x86]]  ;;  %651 = vmatprep.subr.mxu0 %v859_v1  ;;  %v99_v43 = vsel %vm965_vm9, 0.125, %v859_v1  ;;  %vm1000_vm14 = vcmp.eq.s32.totalorder %v102_v37, %v910_v2 }
  0x39   :  { %vm108_vm7 = vcmp.eq.s32.totalorder %v107_v23, %v910_v2  ;;  %v112_v25 = vstv %s928_s18  ;;  %s955_s24 = sld [smem:[#allocation3 + $0x87]]  ;;  %652 = vmatpush3.msra.mxu0 %v241_v26  ;;  %v104_v9 = vsel %vm1000_vm14, 0.125, %v859_v1  ;;  %v233_v23 = vld [vmem:[#allocation4 + $0x8] sm:$0xff] }
  0x3a   :  { %v109_v28 = vsel %vm108_vm7, 0.125, %v859_v1  ;;  %vm113_vm8 = vcmp.eq.s32.totalorder %v112_v25, %v910_v2  ;;  %v117_v29 = vstv %s934_s19  ;;  %s962_s25 = sld [smem:[#allocation3 + $0x100]]  ;;  %v90_v34 = vadd.f32 %v89_v24, %v85_v21  ;;  %653 = vmatprep.subr.mxu0 %v859_v1 }
  0x3b   :  { %v114_v31 = vsel %vm113_vm8, 0.125, %v859_v1  ;;  %vm118_vm10 = vcmp.eq.s32.totalorder %v117_v29, %v910_v2  ;;  %v122_v32 = vstv %s938_s20  ;;  %s972_s0 = sld [smem:[#allocation3 + $0x101]]  ;;  %654 = vmatpush3.msra.mxu0 %v240_v33  ;;  %v232_v29 = vld [vmem:[#allocation4] sm:$0xff]  ;;  %s861_s20 = smov [#allocation10]  }
  0x3c   :  { %v115_v35 = vadd.f32 %v114_v31, %v109_v28  ;;  %v119_v36 = vsel %vm118_vm10, 0.125, %v859_v1  ;;  %vm123_vm11 = vcmp.eq.s32.totalorder %v122_v32, %v910_v2  ;;  %s977_s26 = sld [smem:[#allocation3 + $0x102]]  ;;  %v127_v39 = vstv %s942_s21  ;;  %655 = vmatprep.subr.mxu0 %v859_v1  ;;  %s543_s21 = sshll.u32 %s861_s20, 4  ;;  %s544_s21 = int_to_ptr.vmem [resolvable:$true] %s543_s21 }
  0x3d   :  { %v124_v38 = vsel %vm123_vm11, 0.125, %v859_v1  ;;  %v132_v40 = vstv %s945_s22  ;;  %s983_s27 = sld [smem:[#allocation3 + $0x103]]  ;;  %vm128_vm12 = vcmp.eq.s32.totalorder %v127_v39, %v910_v2  ;;  %v95_v48 = vadd.f32 %v94_v27, %v90_v34  ;;  %656 = vmatpush3.msra.mxu0 %v239_v41  ;;  %s825_s22 = scalar_lea.vmem %s544_s21, 64 }
  0x3e   :  { %v120_v42 = vadd.f32 %v119_v36, %v115_v35  ;;  %vm133_vm13 = vcmp.eq.s32.totalorder %v132_v40, %v910_v2  ;;  %s988_s28 = sld [smem:[#allocation3 + $0x104]]  ;;  %v129_v44 = vsel %vm128_vm12, 0.125, %v859_v1  ;;  %v137_v45 = vstv %s950_s23  ;;  %657 = vmatprep.subr.mxu0 %v859_v1  ;;  %p826_p1 = scmp.ne.s32.totalorder %s544_s21, %s825_s22 }
  0x3f   :  { %v142_v46 = vstv %s955_s24  ;;  %s996_s29 = sld [smem:[#allocation3 + $0x105]]  ;;  %v134_v51 = vsel %vm133_vm13, 0.125, %v859_v1  ;;  %vm1008_vm15 = vcmp.eq.s32.totalorder %v137_v45, %v910_v2  ;;  %658 = vmatpush3.msra.mxu0 %v238_v47  ;;  %v100_v11 = vadd.f32 %v99_v43, %v95_v48  ;;  %p830_p2 = scmp.lt.s32.totalorder %s544_s21, %s544_s21 }
  0x40   :  { %v125_v50 = vadd.f32 %v124_v38, %v120_v42  ;;  %s1005_s30 = sld [smem:[#allocation3 + $0x106]]  ;;  %vm1013_vm1 = vcmp.eq.s32.totalorder %v142_v46, %v910_v2  ;;  %v147_v54 = vstv %s962_s25  ;;  %659 = vmatprep.subr.mxu0 %v859_v1  ;;  %v139_v4 = vsel %vm1008_vm15, 0.125, %v859_v1  ;;  %p831_p3 = scmp.lt.s32.totalorder %s825_s22, %s825_s22 }
  0x41   :  { %v152_v55 = vstv %s972_s0  ;;  %s1019_s6 = sld [smem:[#allocation3 + $0x107]]  ;;  %vm148_vm2 = vcmp.eq.s32.totalorder %v147_v54, %v910_v2  ;;  %660 = vmatpush3.msra.mxu0 %v237_v56  ;;  %v144_v12 = vsel %vm1013_vm1, 0.125, %v859_v1  ;;  %v105_v36 = vadd.f32 %v104_v9, %v100_v11  ;;  %v370_v56 = vld [vmem:[#allocation7 + $0x78] sm:$0xff]  ;;  %v459_v11 = vld [vmem:[#allocation9 + $0x68] sm:$0xff] }
  0x42   :  { %v130_v57 = vadd.f32 %v129_v44, %v125_v50  ;;  %vm153_vm3 = vcmp.eq.s32.totalorder %v152_v55, %v910_v2  ;;  %v157_v58 = vstv %s977_s26  ;;  %s1025_s7 = sld [smem:[#allocation3 + $0x180]]  ;;  %v149_v59 = vsel %vm148_vm2, 0.125, %v859_v1  ;;  %661 = vmatprep.subr.mxu0 %v859_v1  ;;  %675 = vmatpush3.msra.mxu1 %v370_v56  ;;  %v461_v9 = vld [vmem:[#allocation9 + $0x78] sm:$0xff]  ;;  %p832_p4 = por %p831_p3, %p830_p2 }
  0x43   :  { %v154_v60 = vsel %vm153_vm3, 0.125, %v859_v1  ;;  %vm158_vm4 = vcmp.eq.s32.totalorder %v157_v58, %v910_v2  ;;  %v162_v61 = vstv %s983_s27  ;;  %s1031_s8 = sld [smem:[#allocation3 + $0x181]]  ;;  %662 = vmatpush3.msra.mxu0 %v236_v62  ;;  %vm226_vm2 = vcmask 1040384   ;;  %676 = vmatprep.subr.mxu1 %v859_v1  ;;  %v367_v58 = vld [vmem:[#allocation7 + $0x60] sm:$0xff] }
  0x44   :  { %v135_v63 = vadd.f32 %v134_v51, %v130_v57  ;;  %v155_v0 = vadd.f32 %v154_v60, %v149_v59  ;;  %v159_v3 = vsel %vm158_vm4, 0.125, %v859_v1  ;;  %vm163_vm5 = vcmp.eq.s32.totalorder %v162_v61, %v910_v2  ;;  %s1036_s9 = sld [smem:[#allocation3 + $0x182]]  ;;  %663 = vmatprep.subr.mxu0 %v859_v1  ;;  %v368_v57 = vld [vmem:[#allocation7 + $0x68] sm:$0xff]  ;;  %v366_v59 = vld [vmem:[#allocation7 + $0x58] sm:$0xff]  ;;  %v365_v60 = vld [vmem:[#allocation7 + $0x50] sm:$0xff]  ;;  %p833_p5 = pnand %p832_p4, %p826_p1 }
  0x45   :  { %v164_v5 = vsel %vm163_vm5, 0.125, %v859_v1  ;;  %v167_v6 = vstv %s988_s28  ;;  %v172_v7 = vstv %s996_s29  ;;  %s1044_s2 = sld [smem:[#allocation3 + $0x183]]  ;;  %664 = vmatpush3.msra.mxu0 %v235_v8  ;;  %vm228_vm4 = vcmask 1041408   ;;  %v364_v61 = vld [vmem:[#allocation7 + $0x48] sm:$0xff]  ;;  %v363_v62 = vld [vmem:[#allocation7 + $0x40] sm:$0xff] }
  0x46   :  { %v160_v10 = vadd.f32 %v159_v3, %v155_v0  ;;  %vm168_vm6 = vcmp.eq.s32.totalorder %v167_v6, %v910_v2  ;;  %vm173_vm7 = vcmp.eq.s32.totalorder %v172_v7, %v910_v2  ;;  %s1052_s10 = sld [smem:[#allocation3 + $0x184]]  ;;  %v177_v14 = vstv %s1005_s30  ;;  %665 = vmatprep.subr.mxu0 %v859_v1  ;;  %v361_v0 = vld [vmem:[#allocation7 + $0x30] sm:$0xff]  ;;  %v360_v3 = vld [vmem:[#allocation7 + $0x28] sm:$0xff]  ;;  %v355_v8 = vld [vmem:[#allocation7] sm:$0xff] }
  0x47   :  { %v169_v13 = vsel %vm168_vm6, 0.125, %v859_v1  ;;  %s1059_s1 = sld [smem:[#allocation3 + $0x185]]  ;;  %v140_v16 = vadd.f32 %v139_v4, %v135_v63  ;;  %v174_v18 = vsel %vm173_vm7, 0.125, %v859_v1  ;;  %vm178_vm8 = vcmp.eq.s32.totalorder %v177_v14, %v910_v2  ;;  %666 = vmatpush3.msra.mxu0 %v234_v15  ;;  %v362_v63 = vld [vmem:[#allocation7 + $0x38] sm:$0xff]  ;;  %v359_v4 = vld [vmem:[#allocation7 + $0x20] sm:$0xff]  ;;  %v357_v6 = vld [vmem:[#allocation7 + $0x10] sm:$0xff] }
  0x48   :  { %v165_v17 = vadd.f32 %v164_v5, %v160_v10  ;;  %s1064_s11 = sld [smem:[#allocation3 + $0x186]]  ;;  %v179_v19 = vsel %vm178_vm8, 0.125, %v859_v1  ;;  %v182_v20 = vstv %s1019_s6  ;;  %v187_v21 = vstv %s1025_s7  ;;  %667 = vmatprep.subr.mxu0 %v859_v1  ;;  %v358_v5 = vld [vmem:[#allocation7 + $0x18] sm:$0xff]  ;;  %v356_v7 = vld [vmem:[#allocation7 + $0x8] sm:$0xff]  ;;  %v460_v10 = vld [vmem:[#allocation9 + $0x70] sm:$0xff] }
  0x49   :  { %v192_v22 = vstv %s1031_s8  ;;  %s1070_s3 = sld [smem:[#allocation3 + $0x187]]  ;;  %vm188_vm9 = vcmp.eq.s32.totalorder %v187_v21, %v910_v2  ;;  %668 = vmatpush3.msra.mxu0 %v233_v23  ;;  %vm183_vm13 = vcmp.eq.s32.totalorder %v182_v20, %v910_v2  ;;  %v145_v42 = vadd.f32 %v144_v12, %v140_v16  ;;  %v458_v12 = vld [vmem:[#allocation9 + $0x60] sm:$0xff]  ;;  %v456_v14 = vld [vmem:[#allocation9 + $0x50] sm:$0xff]  ;;  %v455_v15 = vld [vmem:[#allocation9 + $0x48] sm:$0xff] }
  0x4a   :  { %v170_v24 = vadd.f32 %v169_v13, %v165_v17  ;;  %vm193_vm10 = vcmp.eq.s32.totalorder %v192_v22, %v910_v2  ;;  %v197_v25 = vstv %s1036_s9  ;;  %v189_v26 = vsel %vm188_vm9, 0.125, %v859_v1  ;;  %669 = vmatprep.subr.mxu0 %v859_v1  ;;  %v457_v13 = vld [vmem:[#allocation9 + $0x58] sm:$0xff] }
  0x4b   :  { %v194_v27 = vsel %vm193_vm10, 0.125, %v859_v1  ;;  %vm198_vm11 = vcmp.eq.s32.totalorder %v197_v25, %v910_v2  ;;  %v202_v28 = vstv %s1044_s2  ;;  %670 = vmatpush3.msra.mxu0 %v232_v29  ;;  %v184_v43 = vsel %vm183_vm13, 0.125, %v859_v1 }
  0x4c   :  { %v175_v30 = vadd.f32 %v174_v18, %v170_v24  ;;  %v195_v31 = vadd.f32 %v194_v27, %v189_v26  ;;  %v199_v32 = vsel %vm198_vm11, 0.125, %v859_v1  ;;  %vm203_vm12 = vcmp.eq.s32.totalorder %v202_v28, %v910_v2  ;;  %709 = vmatprep.subr.mxu0 %v859_v1 }
  0x4d   :  { %v204_v33 = vsel %vm203_vm12, 0.125, %v859_v1  ;;  %v207_v34 = vstv %s1052_s10  ;;  %v212_v35 = vstv %s1059_s1  ;;  %v227_v50 = vsel %vm226_vm2, %v105_v36, %v145_v42 }
  0x4e   :  { %v200_v37 = vadd.f32 %v199_v32, %v195_v31  ;;  %vm208_vm14 = vcmp.eq.s32.totalorder %v207_v34, %v910_v2  ;;  %vm213_vm15 = vcmp.eq.s32.totalorder %v212_v35, %v910_v2  ;;  %v180_v38 = vadd.f32 %v179_v19, %v175_v30 }
  0x4f   :  { %v209_v39 = vsel %vm208_vm14, 0.125, %v859_v1  ;;  %v217_v40 = vstv %s1064_s11  ;;  %v222_v41 = vstv %s1070_s3  ;;  %v214_v45 = vsel %vm213_vm15, 0.125, %v859_v1 }
  0x50   :  { %v205_v44 = vadd.f32 %v204_v33, %v200_v37  ;;  %vm218_vm1 = vcmp.eq.s32.totalorder %v217_v40, %v910_v2  ;;  %vm223_vm3 = vcmp.eq.s32.totalorder %v222_v41, %v910_v2  ;;  %v185_v47 = vadd.f32 %v184_v43, %v180_v38  ;;  %v369_v2 = vld [vmem:[#allocation7 + $0x70] sm:$0xff]  ;;  %v584_v38 = vld [vmem:[%s1151_s4] ss:$0 sm:$0xff]  ;;  %v585_v40 = vld [vmem:[%s1151_s4 + $0x1] ss:$0 sm:$0xff] }
  0x51   :  { %v219_v48 = vsel %vm218_vm1, 0.125, %v859_v1  ;;  %v224_v51 = vsel %vm223_vm3, 0.125, %v859_v1  ;;  %vm230_vm5 = vcmask 1042432   ;;  %677 = vmatpush3.msra.mxu1 %v369_v2  ;;  %v454_v43 = vld [vmem:[#allocation9 + $0x40] sm:$0xff] }
  0x52   :  { %v210_v46 = vadd.f32 %v209_v39, %v205_v44  ;;  %v229_v53 = vsel %vm228_vm4, %v227_v50, %v185_v47  ;;  %678 = vmatprep.subr.mxu1 %v859_v1  ;;  %v453_v44 = vld [vmem:[#allocation9 + $0x38] sm:$0xff]  ;;  %v450_v47 = vld [vmem:[#allocation9 + $0x20] sm:$0xff]  ;;  %v447_v50 = vld [vmem:[#allocation9 + $0x8] sm:$0xff] }
  0x53   :  { %679 = vmatpush3.msra.mxu1 %v368_v57  ;;  %v587_v2 = vld [vmem:[%s1151_s4 + $0x3] ss:$0 sm:$0xff] }
  0x54   :  { %v215_v49 = vadd.f32 %v214_v45, %v210_v46  ;;  %680 = vmatprep.subr.mxu1 %v859_v1  ;;  %v452_v45 = vld [vmem:[#allocation9 + $0x30] sm:$0xff]  ;;  %v451_v46 = vld [vmem:[#allocation9 + $0x28] sm:$0xff] }
  0x55   :  { %681 = vmatpush3.msra.mxu1 %v367_v58 }
  0x56   :  { %v220_v52 = vadd.f32 %v219_v48, %v215_v49  ;;  %682 = vmatprep.subr.mxu1 %v859_v1  ;;  %v449_v48 = vld [vmem:[#allocation9 + $0x18] sm:$0xff]  ;;  %v448_v49 = vld [vmem:[#allocation9 + $0x10] sm:$0xff] }
  0x57   :  { %683 = vmatpush3.msra.mxu1 %v366_v59 }
  0x58   :  { %v225_v54 = vadd.f32 %v224_v51, %v220_v52  ;;  %684 = vmatprep.subr.mxu1 %v859_v1  ;;  %v446_v51 = vld [vmem:[#allocation9] sm:$0xff] }
  0x59   :  { %685 = vmatpush3.msra.mxu1 %v365_v60  ;;  %v586_v52 = vld [vmem:[%s1151_s4 + $0x2] ss:$0 sm:$0xff] }
  0x5a   :  { %v231_v55 = vsel %vm230_vm5, %v229_v53, %v225_v54  ;;  %686 = vmatprep.subr.mxu1 %v859_v1 }
  0x5b   :  { %672 = vmatmul.mubr.f32.vlgmr.msra.gmra.mxu0 %v231_v55  ;;  %687 = vmatpush3.msra.mxu1 %v364_v61 }
  0x5c   :  { %741 = vmatprep.mubr.msk.f32.mxu0 %vm860_vm0, %v859_v1  ;;  %688 = vmatprep.subr.mxu1 %v859_v1  ;;  %vm322_vm0 = vcmask 1043456  }
  0x5d   :  { %689 = vmatpush3.msra.mxu1 %v363_v62  ;;  %710 = vmatpush3.msra.mxu0 %v461_v9 }
  0x5e   :  { %690 = vmatprep.subr.mxu1 %v859_v1  ;;  %711 = vmatprep.subr.mxu0 %v859_v1 }
  0x5f   :  { %691 = vmatpush3.msra.mxu1 %v362_v63  ;;  %712 = vmatpush3.msra.mxu0 %v460_v10 }
  0x60   :  { %692 = vmatprep.subr.mxu1 %v859_v1  ;;  %713 = vmatprep.subr.mxu0 %v859_v1 }
  0x61   :  { %693 = vmatpush3.msra.mxu1 %v361_v0  ;;  %714 = vmatpush3.msra.mxu0 %v459_v11 }
  0x62   :  { %694 = vmatprep.subr.mxu1 %v859_v1  ;;  %715 = vmatprep.subr.mxu0 %v859_v1 }
  0x63   :  { %695 = vmatpush3.msra.mxu1 %v360_v3  ;;  %716 = vmatpush3.msra.mxu0 %v458_v12 }
  0x64   :  { %696 = vmatprep.subr.mxu1 %v859_v1  ;;  %717 = vmatprep.subr.mxu0 %v859_v1 }
  0x65   :  { %697 = vmatpush3.msra.mxu1 %v359_v4  ;;  %718 = vmatpush3.msra.mxu0 %v457_v13 }
  0x66   :  { %698 = vmatprep.subr.mxu1 %v859_v1  ;;  %719 = vmatprep.subr.mxu0 %v859_v1 }
  0x67   :  { %699 = vmatpush3.msra.mxu1 %v358_v5  ;;  %720 = vmatpush3.msra.mxu0 %v456_v14 }
  0x68   :  { %700 = vmatprep.subr.mxu1 %v859_v1  ;;  %721 = vmatprep.subr.mxu0 %v859_v1 }
  0x69   :  { %701 = vmatpush3.msra.mxu1 %v357_v6  ;;  %722 = vmatpush3.msra.mxu0 %v455_v15 }
  0x6a   :  { %702 = vmatprep.subr.mxu1 %v859_v1  ;;  %723 = vmatprep.subr.mxu0 %v859_v1 }
  0x6b   :  { %703 = vmatpush3.msra.mxu1 %v356_v7  ;;  %724 = vmatpush3.msra.mxu0 %v454_v43 }
  0x6c   :  { %704 = vmatprep.subr.mxu1 %v859_v1  ;;  %725 = vmatprep.subr.mxu0 %v859_v1 }
  0x6d   :  { %705 = vmatpush3.msra.mxu1 %v355_v8  ;;  %726 = vmatpush3.msra.mxu0 %v453_v44 }
  0x6e   :  { %727 = vmatprep.subr.mxu0 %v859_v1 }
  0x6f   :  { %728 = vmatpush3.msra.mxu0 %v452_v45 }
  0x70   :  { %729 = vmatprep.subr.mxu0 %v859_v1 }
  0x71   :  { %730 = vmatpush3.msra.mxu0 %v451_v46 }
  0x72   :  { %731 = vmatprep.subr.mxu0 %v859_v1 }
  0x73   :  { %732 = vmatpush3.msra.mxu0 %v450_v47 }
  0x74   :  { %733 = vmatprep.subr.mxu0 %v859_v1 }
  0x75   :  { %734 = vmatpush3.msra.mxu0 %v449_v48 }
  0x76   :  { %735 = vmatprep.subr.mxu0 %v859_v1 }
  0x77   :  { %736 = vmatpush3.msra.mxu0 %v448_v49 }
  0x78   :  { %737 = vmatprep.subr.mxu0 %v859_v1 }
  0x79   :  { %738 = vmatpush3.msra.mxu0 %v447_v50 }
  0x7a   :  { %739 = vmatprep.subr.mxu0 %v859_v1 }
  0x7b   :  { %740 = vmatpush3.msra.mxu0 %v446_v51 }
 0x11b   :  { %v314_v16 = vpop.f32.mrf.mxu0 }
 0x11c   :  { %v323_v17 = vsel %vm322_vm0, %v314_v16, 0.0 }
 0x11d   :  { %v324_v18 = vrot.slane %v323_v17, 4  ;;  %v673_v19 = vpop.f32.mrf.mxu0 }
 0x11f   :  { %v325_v20 = vadd.f32 %v324_v18, %v323_v17 }
 0x121   :  { %v326_v21 = vrot.slane %v325_v20, 2 }
 0x123   :  { %v327_v22 = vadd.f32 %v326_v21, %v325_v20 }
 0x125   :  { %v328_v23 = vrot.slane %v327_v22, 1 }
 0x127   :  { %v329_v24 = vadd.f32 %v328_v23, %v327_v22 }
 0x129   :  { %v331_v25 = vmul.f32 0.25, %v329_v24 }
 0x12b   :  { %v332_v26 = vsub.f32 %v314_v16, %v331_v25 }
 0x12d   :  { %v333_v27 = vmul.f32 %v332_v26, %v332_v26 }
 0x12f   :  { %v334_v28 = vsel %vm322_vm0, %v333_v27, 0.0 }
 0x130   :  { %v335_v29 = vrot.slane %v334_v28, 4 }
 0x132   :  { %v336_v30 = vadd.f32 %v335_v29, %v334_v28 }
 0x134   :  { %v337_v31 = vrot.slane %v336_v30, 2 }
 0x136   :  { %v338_v32 = vadd.f32 %v337_v31, %v336_v30 }
 0x138   :  { %v339_v33 = vrot.slane %v338_v32, 1 }
 0x13a   :  { %v340_v34 = vadd.f32 %v339_v33, %v338_v32 }
 0x13c   :  { %v341_v35 = vmul.f32 0.25, %v340_v34 }
 0x13e   :  { %v342_v36 = vadd.f32 1e-05, %v341_v35 }
 0x140   :  { %753 = vrsqrt.f32 %v342_v36 }
 0x14d   :  { %v754_v37 = vpop.eup %753 }
 0x14e   :  { %v344_v39 = vmul.f32 %v754_v37, %v332_v26 }
 0x150   :  { %v349_v41 = vmul.f32 %v584_v38, %v344_v39 }
 0x152   :  { %v354_v42 = vadd.f32 %v585_v40, %v349_v41 }
 0x154   :  { %707 = vmatmul.mubr.f32.vlgmr.msra.gmra.mxu1 %v354_v42 }
 0x214   :  { %v441_v53 = vpop.f32.mrf.mxu1 }
 0x215   :  { %v442_v54 = vadd.f32 %v586_v52, %v441_v53 }
 0x216   :  { %v708_v55 = vpop.f32.mrf.mxu1 }
 0x217   :  { %755 = vtanh.f32 %v442_v54 }
 0x224   :  { %v756_v56 = vpop.eup %755 }
 0x225   :  { %742 = vmatmul.mubr.f32.vlgmr.msra.gmra.mxu0 %v756_v56 }
 0x2e5   :  { %v532_v57 = vpop.f32.mrf.mxu0 }
 0x2e6   :  { %v533_v58 = vadd.f32 %v587_v2, %v532_v57 }
 0x2e7   :  { %v743_v1 = vpop.f32.mrf.mxu0 }
 0x2e8   :  { %536 = vst [vmem:[#allocation10] sm:$0xf] %v533_v58 }
 0x2e9   :  { %836 = shalt.err (!%p833_p5)
}
 0x2ea   :  { %546 = dma.vmem_to_hbm [thread:$0]  %s544_s21, 64, %s1152_s5, [#allocation6]  }
 0x2eb   :  { %851 = dma.done.wait [#allocation6], 64  }
 0x2ec   :  { %852 = vsyncadd [#allocation6], 4294967232 }
 0x2ed   :  { %550 = vsyncpa [#allocation5], 1 }
 0x2ee   :  { %551 = vsyncpa [#allocation8], 1 }
 0x2ef   :  { %552 = vsyncpa [#allocation6], 1 }

</bundles_post_ra>
